<compile_context>
chip_gen: v6e
topology: v6e:2x2x1
jax: 0.10.0
libtpu: 0.0.40
codegen_flags: <defaults>
</compile_context>

<pallas_src>
import jax
import jax.numpy as jnp
from jax.experimental import pallas as pl
from jax.experimental.pallas import tpu as pltpu


def _make_conv_relu_bias_kernel(N, Cp, H, W, KH, KW, Cout):
    HW = H * W

    def kernel(x_ref, w_ref, b_ref, o_ref):
        # x_ref: (N, Cp, HW + (KH-1)*W + (KW-1))  zero-padded, spatially-flattened NCHW image
        # w_ref: (Cout, KH*KW*Cp)                 rows ordered (kh, kw, c), c fastest
        # b_ref: (Cout, 2)                        col 0 = conv bias, col 1 = extra bias
        # o_ref: (N, Cout, HW)                    conv output over the full HxW grid
        #                                         (only h < H-KH+1, w < W-KW+1 is valid)
        w = w_ref[...]
        b = b_ref[...]
        conv_b = b[:, 0:1]         # (Cout, 1) -> broadcasts along the output lanes
        extra_b = b[:, 1:2]

        for n in range(N):         # N is tiny and static -> fully unrolled
            xn = x_ref[n]          # (Cp, HW_padded)
            # im2col: tap (kh, kw) is the flattened image shifted left by kh*W + kw lanes,
            # so lane h*W + w of the tap holds x[c, h+kh, w+kw].
            taps = []
            for kh in range(KH):
                for kw in range(KW):
                    s = kh * W + kw
                    taps.append(xn[:, s:s + HW])                 # (Cp, HW)
            # (KH*KW*Cp, HW); Cp == 8 keeps every piece a full (8,128) sublane tile.
            col = jnp.concatenate(taps, axis=0)
            # One MXU matmul per image: (Cout, K) @ (K, HW) with f32 accumulation.
            acc = jnp.dot(w, col, preferred_element_type=jnp.float32)
            acc = jnp.maximum(acc + conv_b, 0.0) + extra_b       # bias -> ReLU -> bias
            o_ref[n] = acc.astype(o_ref.dtype)

    return kernel


@jax.jit
def conv2d_relu_bias(x_nchw, weight_oihw, conv_bias, extra_bias):
    """x: (N, Cin, H, W); weight: (Cout, Cin, KH, KW); conv_bias: (Cout,);
    extra_bias: (Cout, 1, 1).  Returns (N, Cout, H-KH+1, W-KW+1) (same as the torch module)."""
    N, Cin, H, W = x_nchw.shape
    Cout, _, KH, KW = weight_oihw.shape
    H_out, W_out = H - KH + 1, W - KW + 1
    HW = H * W

    # Round channels up to a full sublane tile and append enough spatial zeros that every
    # shifted im2col window stays in bounds.  Pure zero-pad of a reshape of native NCHW:
    # no activation transposes around the kernel.
    Cp = ((Cin + 7) // 8) * 8
    spatial_pad = (KH - 1) * W + (KW - 1)
    x_flat = x_nchw.reshape(N, Cin, HW)
    x_padded = jnp.pad(x_flat, ((0, 0), (0, Cp - Cin), (0, spatial_pad)))

    # Tiny parameter-side prep (done once under jit): flatten weight to (Cout, KH*KW*Cp)
    # with row order (kh, kw, c); pack both biases into one (Cout, 2) operand.
    w_padded = jnp.pad(weight_oihw, ((0, 0), (0, Cp - Cin), (0, 0), (0, 0)))
    w_mat = jnp.transpose(w_padded, (0, 2, 3, 1)).reshape(Cout, KH * KW * Cp)
    biases = jnp.stack([conv_bias, extra_bias.reshape(Cout)], axis=1)     # (Cout, 2)

    out_flat = pl.pallas_call(
        _make_conv_relu_bias_kernel(N, Cp, H, W, KH, KW, Cout),
        out_shape=jax.ShapeDtypeStruct((N, Cout, HW), x_nchw.dtype),
        in_specs=[
            pl.BlockSpec(memory_space=pltpu.MemorySpace.VMEM),
            pl.BlockSpec(memory_space=pltpu.MemorySpace.VMEM),
            pl.BlockSpec(memory_space=pltpu.MemorySpace.VMEM),
        ],
        out_specs=pl.BlockSpec(memory_space=pltpu.MemorySpace.VMEM),
    )(x_padded, w_mat, biases)

    # Free reshape back to NCHW; drop rows/cols whose receptive field left the image.
    return out_flat.reshape(N, Cout, H, W)[:, :, :H_out, :W_out]


if __name__ == "__main__":
    # Module config (from the PyTorch spec)
    in_channels, out_channels, kernel_size = 3, 16, 3
    batch, H, W = 2, 16, 16

    key = jax.random.PRNGKey(0)
    kx, kw, kb, keb = jax.random.split(key, 4)

    # Deterministic parameter init (shapes match nn.Conv2d + nn.Parameter(randn(Cout,1,1)))
    fan_in = in_channels * kernel_size * kernel_size
    bound = 1.0 / (fan_in ** 0.5)
    weight = jax.random.uniform(kw, (out_channels, in_channels, kernel_size, kernel_size),
                                jnp.float32, -bound, bound)
    conv_bias = jax.random.uniform(kb, (out_channels,), jnp.float32, -bound, bound)
    extra_bias = jax.random.normal(keb, (out_channels, 1, 1), jnp.float32)

    x = jax.random.normal(kx, (batch, in_channels, H, W), jnp.float32)

    out = jax.block_until_ready(conv2d_relu_bias(x, weight, conv_bias, extra_bias))

    # Reference with plain JAX (same semantics as the PyTorch module).
    ref = jax.lax.conv_general_dilated(
        x, weight, window_strides=(1, 1), padding="VALID",
        dimension_numbers=("NCHW", "OIHW", "NCHW"),
        precision=jax.lax.Precision.HIGHEST)
    ref = ref + conv_bias[None, :, None, None]
    ref = jnp.maximum(ref, 0.0)
    ref = ref + extra_bias[None, :, :, :]

    assert out.shape == (batch, out_channels, H - kernel_size + 1, W - kernel_size + 1)
    max_err = float(jnp.max(jnp.abs(out - ref)))
    assert jnp.allclose(out, ref, atol=1e-3, rtol=1e-3), f"max |err| = {max_err}"
    print("KERNEL_OK")
</pallas_src>

<mosaic_0001>
module attributes {stable_mosaic.version = 11 : i64} {
  func.func @kernel(%arg0: memref<2x8x290xf32, #tpu.memory_space<vmem>>, %arg1: memref<16x72xf32, #tpu.memory_space<vmem>>, %arg2: memref<16x2xf32, #tpu.memory_space<vmem>>, %arg3: memref<2x16x256xf32, #tpu.memory_space<vmem>>) attributes {dimension_semantics = [], scalar_prefetch = 0 : i64, scratch_operands = 0 : i64, tpu.core_type = #tpu.core_type<tc>} {
    %c0 = arith.constant 0 : index
    %c0_0 = arith.constant 0 : index
    %0 = vector.load %arg1[%c0, %c0_0] : memref<16x72xf32, #tpu.memory_space<vmem>>, vector<16x72xf32>
    %c0_1 = arith.constant 0 : index
    %c0_2 = arith.constant 0 : index
    %1 = vector.load %arg2[%c0_1, %c0_2] : memref<16x2xf32, #tpu.memory_space<vmem>>, vector<16x2xf32>
    %2 = vector.extract_strided_slice %1 {offsets = [0, 0], sizes = [16, 1], strides = [1, 1]} : vector<16x2xf32> to vector<16x1xf32>
    %3 = vector.extract_strided_slice %1 {offsets = [0, 1], sizes = [16, 1], strides = [1, 1]} : vector<16x2xf32> to vector<16x1xf32>
    %c0_3 = arith.constant 0 : index
    %c0_4 = arith.constant 0 : index
    %c0_5 = arith.constant 0 : index
    %4 = vector.load %arg0[%c0_3, %c0_4, %c0_5] : memref<2x8x290xf32, #tpu.memory_space<vmem>>, vector<1x8x290xf32>
    %5 = vector.shape_cast %4 : vector<1x8x290xf32> to vector<8x290xf32>
    %6 = vector.extract_strided_slice %5 {offsets = [0, 0], sizes = [8, 256], strides = [1, 1]} : vector<8x290xf32> to vector<8x256xf32>
    %7 = vector.extract_strided_slice %5 {offsets = [0, 1], sizes = [8, 256], strides = [1, 1]} : vector<8x290xf32> to vector<8x256xf32>
    %8 = vector.extract_strided_slice %5 {offsets = [0, 2], sizes = [8, 256], strides = [1, 1]} : vector<8x290xf32> to vector<8x256xf32>
    %9 = vector.extract_strided_slice %5 {offsets = [0, 16], sizes = [8, 256], strides = [1, 1]} : vector<8x290xf32> to vector<8x256xf32>
    %10 = vector.extract_strided_slice %5 {offsets = [0, 17], sizes = [8, 256], strides = [1, 1]} : vector<8x290xf32> to vector<8x256xf32>
    %11 = vector.extract_strided_slice %5 {offsets = [0, 18], sizes = [8, 256], strides = [1, 1]} : vector<8x290xf32> to vector<8x256xf32>
    %12 = vector.extract_strided_slice %5 {offsets = [0, 32], sizes = [8, 256], strides = [1, 1]} : vector<8x290xf32> to vector<8x256xf32>
    %13 = vector.extract_strided_slice %5 {offsets = [0, 33], sizes = [8, 256], strides = [1, 1]} : vector<8x290xf32> to vector<8x256xf32>
    %14 = vector.extract_strided_slice %5 {offsets = [0, 34], sizes = [8, 256], strides = [1, 1]} : vector<8x290xf32> to vector<8x256xf32>
    %15 = tpu.concatenate %6, %7, %8, %9, %10, %11, %12, %13, %14 in 0 : vector<8x256xf32>, vector<8x256xf32>, vector<8x256xf32>, vector<8x256xf32>, vector<8x256xf32>, vector<8x256xf32>, vector<8x256xf32>, vector<8x256xf32>, vector<8x256xf32> -> vector<72x256xf32>
    %cst = arith.constant dense<0.000000e+00> : vector<16x256xf32>
    %16 = tpu.matmul %0, %15, %cst {dimension_numbers = #tpu.dot_dimension_numbers<[1], [0], [0], [1], [0, 0, 1, 1], [], []>} : vector<16x72xf32>, vector<72x256xf32>, vector<16x256xf32> -> vector<16x256xf32>
    %17 = vector.broadcast %2 : vector<16x1xf32> to vector<16x256xf32>
    %18 = arith.addf %16, %17 : vector<16x256xf32>
    %cst_6 = arith.constant 0.000000e+00 : f32
    %19 = vector.broadcast %cst_6 : f32 to vector<16x256xf32>
    %20 = arith.maximumf %18, %19 : vector<16x256xf32>
    %21 = vector.broadcast %3 : vector<16x1xf32> to vector<16x256xf32>
    %22 = arith.addf %20, %21 : vector<16x256xf32>
    %c0_7 = arith.constant 0 : index
    %c0_8 = arith.constant 0 : index
    %c0_9 = arith.constant 0 : index
    %23 = vector.load %arg3[%c0_7, %c0_8, %c0_9] : memref<2x16x256xf32, #tpu.memory_space<vmem>>, vector<1x16x256xf32>
    %24 = vector.shape_cast %23 : vector<1x16x256xf32> to vector<16x256xf32>
    %25 = vector.shape_cast %22 : vector<16x256xf32> to vector<1x16x256xf32>
    tpu.vector_store %arg3[%c0_7, %c0_8, %c0_9], %25 {strides = array<i32>} : memref<2x16x256xf32, #tpu.memory_space<vmem>>, vector<1x16x256xf32>,
    %c1 = arith.constant 1 : index
    %c0_10 = arith.constant 0 : index
    %c0_11 = arith.constant 0 : index
    %26 = vector.load %arg0[%c1, %c0_10, %c0_11] : memref<2x8x290xf32, #tpu.memory_space<vmem>>, vector<1x8x290xf32>
    %27 = vector.shape_cast %26 : vector<1x8x290xf32> to vector<8x290xf32>
    %28 = vector.extract_strided_slice %27 {offsets = [0, 0], sizes = [8, 256], strides = [1, 1]} : vector<8x290xf32> to vector<8x256xf32>
    %29 = vector.extract_strided_slice %27 {offsets = [0, 1], sizes = [8, 256], strides = [1, 1]} : vector<8x290xf32> to vector<8x256xf32>
    %30 = vector.extract_strided_slice %27 {offsets = [0, 2], sizes = [8, 256], strides = [1, 1]} : vector<8x290xf32> to vector<8x256xf32>
    %31 = vector.extract_strided_slice %27 {offsets = [0, 16], sizes = [8, 256], strides = [1, 1]} : vector<8x290xf32> to vector<8x256xf32>
    %32 = vector.extract_strided_slice %27 {offsets = [0, 17], sizes = [8, 256], strides = [1, 1]} : vector<8x290xf32> to vector<8x256xf32>
    %33 = vector.extract_strided_slice %27 {offsets = [0, 18], sizes = [8, 256], strides = [1, 1]} : vector<8x290xf32> to vector<8x256xf32>
    %34 = vector.extract_strided_slice %27 {offsets = [0, 32], sizes = [8, 256], strides = [1, 1]} : vector<8x290xf32> to vector<8x256xf32>
    %35 = vector.extract_strided_slice %27 {offsets = [0, 33], sizes = [8, 256], strides = [1, 1]} : vector<8x290xf32> to vector<8x256xf32>
    %36 = vector.extract_strided_slice %27 {offsets = [0, 34], sizes = [8, 256], strides = [1, 1]} : vector<8x290xf32> to vector<8x256xf32>
    %37 = tpu.concatenate %28, %29, %30, %31, %32, %33, %34, %35, %36 in 0 : vector<8x256xf32>, vector<8x256xf32>, vector<8x256xf32>, vector<8x256xf32>, vector<8x256xf32>, vector<8x256xf32>, vector<8x256xf32>, vector<8x256xf32>, vector<8x256xf32> -> vector<72x256xf32>
    %cst_12 = arith.constant dense<0.000000e+00> : vector<16x256xf32>
    %38 = tpu.matmul %0, %37, %cst_12 {dimension_numbers = #tpu.dot_dimension_numbers<[1], [0], [0], [1], [0, 0, 1, 1], [], []>} : vector<16x72xf32>, vector<72x256xf32>, vector<16x256xf32> -> vector<16x256xf32>
    %39 = vector.broadcast %2 : vector<16x1xf32> to vector<16x256xf32>
    %40 = arith.addf %38, %39 : vector<16x256xf32>
    %cst_13 = arith.constant 0.000000e+00 : f32
    %41 = vector.broadcast %cst_13 : f32 to vector<16x256xf32>
    %42 = arith.maximumf %40, %41 : vector<16x256xf32>
    %43 = vector.broadcast %3 : vector<16x1xf32> to vector<16x256xf32>
    %44 = arith.addf %42, %43 : vector<16x256xf32>
    %c1_14 = arith.constant 1 : index
    %c0_15 = arith.constant 0 : index
    %c0_16 = arith.constant 0 : index
    %45 = vector.load %arg3[%c1_14, %c0_15, %c0_16] : memref<2x16x256xf32, #tpu.memory_space<vmem>>, vector<1x16x256xf32>
    %46 = vector.shape_cast %45 : vector<1x16x256xf32> to vector<16x256xf32>
    %47 = vector.shape_cast %44 : vector<16x256xf32> to vector<1x16x256xf32>
    tpu.vector_store %arg3[%c1_14, %c0_15, %c0_16], %47 {strides = array<i32>} : memref<2x16x256xf32, #tpu.memory_space<vmem>>, vector<1x16x256xf32>,
    return
  }
}

</mosaic_0001>

<bundles_post_ra>
// kernel: conv2d_relu_bias.1
= control target key start
LH: loop header
LB: loop body
LE: loop exit
PB: predicated region body
PF: predicated region fallthrough
CT: control target
= control target key end

     0   :  { %s433_s16 = smov 94   ;;  %s434_s25 = smov 95   ;;  %v440_v6 = vmov 0.0   ;;  %v442_v7 = vmov 0   ;;  %v443_v10 = vmov 1   ;;  %vm107_vm0 = vcmask 769024   ;;  %s566_s0 = inlined_call_operand.vmem [shape: f32[2,8,290], index: 0, kind: input, shape index: {}]   ;;  %s567_s2 = inlined_call_operand.vmem [shape: f32[16,2], index: 2, kind: input, shape index: {}]   ;;  %s568_s1 = inlined_call_operand.vmem [shape: f32[16,72], index: 1, kind: input, shape index: {}]   ;;  %s569_s3 = inlined_call_operand.vmem [shape: f32[2,16,256], index: 3, kind: output, shape index: {}]  }
   0x1   :  { %v467_v0 = vld [vmem:[%s566_s0 + $0x20] sm:$0xff]  ;;  %v472_v1 = vld [vmem:[%s566_s0 + $0x8] sm:$0xff]  ;;  %v20_v3 = vld [vmem:[%s566_s0 + $0x10] sm:$0xff]  ;;  %s435_s26 = smov 96   ;;  %s437_s27 = smov 111   ;;  %193 = vmatprep.mubr.f32.mxu0 %v440_v6  ;;  %377 = vmatprep.mubr.f32.mxu1 %v440_v6  ;;  %vm96_vm1 = vcmask 777216  }
   0x2   :  { %305 = vrot.lane.b32.xlu1 %v467_v0, %s433_s16  ;;  %103 = vrot.lane.b32.xlu0 %v472_v1, %s433_s16  ;;  %v411_v2 = vld [vmem:[%s566_s0 + $0x28] sm:$0xff]  ;;  %v485_v4 = vld [vmem:[%s566_s0 + $0x18] sm:$0xff]  ;;  %s438_s28 = smov 112   ;;  %s439_s29 = smov 126   ;;  %vm85_vm2 = vcmask 785408   ;;  %vm74_vm3 = vcmask 900096  }
   0x3   :  { %v490_v5 = vld [vmem:[%s566_s0] sm:$0xff]  ;;  %s436_s0 = smov 110   ;;  %s441_s30 = smov 127   ;;  %430 = vset.pattern.permute.xlu1 %v442_v7  ;;  %429 = vset.pattern.permute.xlu0 %v442_v7  ;;  %v17_v8 = vld [vmem:[%s567_s2 + $0x8] sm:$0xff]  ;;  %vm63_vm4 = vcmask 908288   ;;  %vm52_vm5 = vcmask 916480  }
   0x4   :  { %v16_v9 = vld [vmem:[%s567_s2] sm:$0xff]  ;;  %vm41_vm6 = vcmask 1031168   ;;  %vm30_vm7 = vcmask 1039360   ;;  %vm122_vm8 = vcmask 588800  }
   0x6   :  { %307 = vrot.lane.b32.xlu1 %v411_v2, %s433_s16  ;;  %105 = vrot.lane.b32.xlu0 %v20_v3, %s433_s16 }
   0xa   :  { %303 = vrot.lane.b32.xlu1 %v485_v4, %s433_s16  ;;  %101 = vrot.lane.b32.xlu0 %v490_v5, %s433_s16 }
   0xe   :  { %94 = vrot.lane.b32.xlu1 %v20_v3, %s434_s25  ;;  %92 = vrot.lane.b32.xlu0 %v472_v1, %s434_s25 }
  0x12   :  { %297 = vrot.lane.b32.xlu1 %v411_v2, %s434_s25  ;;  %295 = vrot.lane.b32.xlu0 %v467_v0, %s434_s25 }
  0x16   :  { %293 = vrot.lane.b32.xlu1 %v485_v4, %s434_s25  ;;  %90 = vrot.lane.b32.xlu0 %v490_v5, %s434_s25 }
  0x1a   :  { %83 = vrot.lane.b32.xlu1 %v20_v3, %s435_s26  ;;  %81 = vrot.lane.b32.xlu0 %v472_v1, %s435_s26 }
  0x1e   :  { %287 = vrot.lane.b32.xlu1 %v411_v2, %s435_s26  ;;  %285 = vrot.lane.b32.xlu0 %v467_v0, %s435_s26 }
  0x22   :  { %283 = vrot.lane.b32.xlu1 %v485_v4, %s435_s26  ;;  %79 = vrot.lane.b32.xlu0 %v490_v5, %s435_s26 }
  0x26   :  { %72 = vrot.lane.b32.xlu1 %v20_v3, %s436_s0  ;;  %70 = vrot.lane.b32.xlu0 %v472_v1, %s436_s0 }
  0x2a   :  { %277 = vrot.lane.b32.xlu1 %v411_v2, %s436_s0  ;;  %275 = vrot.lane.b32.xlu0 %v467_v0, %s436_s0 }
  0x2e   :  { %273 = vrot.lane.b32.xlu1 %v485_v4, %s436_s0  ;;  %68 = vrot.lane.b32.xlu0 %v490_v5, %s436_s0 }
  0x32   :  { %61 = vrot.lane.b32.xlu1 %v20_v3, %s437_s27  ;;  %59 = vrot.lane.b32.xlu0 %v472_v1, %s437_s27 }
  0x36   :  { %267 = vrot.lane.b32.xlu1 %v411_v2, %s437_s27  ;;  %265 = vrot.lane.b32.xlu0 %v467_v0, %s437_s27 }
  0x3a   :  { %263 = vrot.lane.b32.xlu1 %v485_v4, %s437_s27  ;;  %57 = vrot.lane.b32.xlu0 %v490_v5, %s437_s27 }
  0x3e   :  { %50 = vrot.lane.b32.xlu1 %v20_v3, %s438_s28  ;;  %48 = vrot.lane.b32.xlu0 %v472_v1, %s438_s28 }
  0x42   :  { %257 = vrot.lane.b32.xlu1 %v411_v2, %s438_s28  ;;  %255 = vrot.lane.b32.xlu0 %v467_v0, %s438_s28 }
  0x46   :  { %253 = vrot.lane.b32.xlu1 %v485_v4, %s438_s28  ;;  %46 = vrot.lane.b32.xlu0 %v490_v5, %s438_s28 }
  0x4a   :  { %39 = vrot.lane.b32.xlu1 %v20_v3, %s439_s29  ;;  %37 = vrot.lane.b32.xlu0 %v472_v1, %s439_s29 }
  0x4e   :  { %247 = vrot.lane.b32.xlu1 %v411_v2, %s439_s29  ;;  %245 = vrot.lane.b32.xlu0 %v467_v0, %s439_s29 }
  0x52   :  { %243 = vrot.lane.b32.xlu1 %v485_v4, %s439_s29  ;;  %35 = vrot.lane.b32.xlu0 %v490_v5, %s439_s29 }
  0x56   :  { %28 = vrot.lane.b32.xlu1 %v20_v3, %s441_s30  ;;  %26 = vrot.lane.b32.xlu0 %v472_v1, %s441_s30 }
  0x5a   :  { %237 = vrot.lane.b32.xlu1 %v411_v2, %s441_s30  ;;  %235 = vrot.lane.b32.xlu0 %v467_v0, %s441_s30 }
  0x5e   :  { %233 = vrot.lane.b32.xlu1 %v485_v4, %s441_s30  ;;  %24 = vrot.lane.b32.xlu0 %v490_v5, %s441_s30 }
  0x62   :  { %119 = vperm.xlu1 %430, %v17_v8   ;;  %114 = vperm.xlu0 %429, %v16_v9  }
  0x66   :  { %431 = vset.pattern.permute.xlu1 %v443_v10  ;;  %432 = vset.pattern.permute.xlu0 %v443_v10 }
  0x67   :  { %211 = vperm.xlu1 %431, %v16_v9   ;;  %215 = vperm.xlu0 %432, %v17_v8  }
  0x74   :  { %v306_v11 = vpop.permute.xlu1 %305  ;;  %v104_v12 = vpop.permute.xlu0 %103 }
  0x78   :  { %v308_v13 = vpop.permute.xlu1 %307  ;;  %v106_v14 = vpop.permute.xlu0 %105 }
  0x79   :  { %v109_v15 = vsel %vm107_vm0, %v104_v12, %v106_v14  ;;  %v310_v16 = vsel %vm107_vm0, %v306_v11, %v308_v13 }
  0x7a   :  { %143 = vmatprep.subr.mxu0 %v109_v15  ;;  %327 = vmatprep.subr.mxu1 %v310_v16 }
  0x7c   :  { %v304_v17 = vpop.permute.xlu1 %303  ;;  %v102_v18 = vpop.permute.xlu0 %101 }
  0x7d   :  { %v108_v19 = vsel %vm107_vm0, %v102_v18, %v104_v12  ;;  %v309_v20 = vsel %vm107_vm0, %v304_v17, %v306_v11 }
  0x7e   :  { %144 = vmatpush1.msra.mxu0 %v108_v19  ;;  %328 = vmatpush1.msra.mxu1 %v309_v20 }
  0x80   :  { %v95_v21 = vpop.permute.xlu1 %94  ;;  %v93_v22 = vpop.permute.xlu0 %92 }
  0x81   :  { %v98_v23 = vsel %vm96_vm1, %v93_v22, %v95_v21 }
  0x82   :  { %145 = vmatprep.subr.mxu0 %v98_v23 }
  0x84   :  { %v298_v24 = vpop.permute.xlu1 %297  ;;  %v296_v25 = vpop.permute.xlu0 %295 }
  0x85   :  { %v300_v26 = vsel %vm96_vm1, %v296_v25, %v298_v24 }
  0x86   :  { %329 = vmatprep.subr.mxu1 %v300_v26 }
  0x88   :  { %v294_v27 = vpop.permute.xlu1 %293  ;;  %v91_v28 = vpop.permute.xlu0 %90 }
  0x89   :  { %v97_v29 = vsel %vm96_vm1, %v91_v28, %v93_v22  ;;  %v299_v30 = vsel %vm96_vm1, %v294_v27, %v296_v25 }
  0x8a   :  { %146 = vmatpush1.msra.mxu0 %v97_v29  ;;  %330 = vmatpush1.msra.mxu1 %v299_v30 }
  0x8c   :  { %v84_v31 = vpop.permute.xlu1 %83  ;;  %v82_v32 = vpop.permute.xlu0 %81 }
  0x8d   :  { %v87_v33 = vsel %vm85_vm2, %v82_v32, %v84_v31 }
  0x8e   :  { %147 = vmatprep.subr.mxu0 %v87_v33  ;;  %v15_v33 = vld [vmem:[%s568_s1 + $0x8] sm:$0xff] }
  0x90   :  { %v288_v34 = vpop.permute.xlu1 %287  ;;  %v286_v35 = vpop.permute.xlu0 %285 }
  0x91   :  { %v290_v36 = vsel %vm85_vm2, %v286_v35, %v288_v34 }
  0x92   :  { %331 = vmatprep.subr.mxu1 %v290_v36 }
  0x94   :  { %v284_v37 = vpop.permute.xlu1 %283  ;;  %v80_v38 = vpop.permute.xlu0 %79 }
  0x95   :  { %v86_v39 = vsel %vm85_vm2, %v80_v38, %v82_v32  ;;  %v289_v40 = vsel %vm85_vm2, %v284_v37, %v286_v35  ;;  %v14_v32 = vld [vmem:[%s568_s1] sm:$0xff] }
  0x96   :  { %148 = vmatpush1.msra.mxu0 %v86_v39  ;;  %332 = vmatpush1.msra.mxu1 %v289_v40 }
  0x98   :  { %v73_v41 = vpop.permute.xlu1 %72  ;;  %v71_v42 = vpop.permute.xlu0 %70 }
  0x99   :  { %v76_v43 = vsel %vm74_vm3, %v71_v42, %v73_v41 }
  0x9a   :  { %149 = vmatprep.subr.mxu0 %v76_v43 }
  0x9c   :  { %v278_v44 = vpop.permute.xlu1 %277  ;;  %v276_v45 = vpop.permute.xlu0 %275 }
  0x9d   :  { %v280_v46 = vsel %vm74_vm3, %v276_v45, %v278_v44 }
  0x9e   :  { %333 = vmatprep.subr.mxu1 %v280_v46 }
  0xa0   :  { %v274_v47 = vpop.permute.xlu1 %273  ;;  %v69_v48 = vpop.permute.xlu0 %68 }
  0xa1   :  { %v75_v49 = vsel %vm74_vm3, %v69_v48, %v71_v42  ;;  %v279_v50 = vsel %vm74_vm3, %v274_v47, %v276_v45 }
  0xa2   :  { %150 = vmatpush1.msra.mxu0 %v75_v49  ;;  %334 = vmatpush1.msra.mxu1 %v279_v50 }
  0xa4   :  { %v62_v51 = vpop.permute.xlu1 %61  ;;  %v60_v52 = vpop.permute.xlu0 %59 }
  0xa5   :  { %v65_v53 = vsel %vm63_vm4, %v60_v52, %v62_v51 }
  0xa6   :  { %151 = vmatprep.subr.mxu0 %v65_v53 }
  0xa8   :  { %v268_v54 = vpop.permute.xlu1 %267  ;;  %v266_v55 = vpop.permute.xlu0 %265 }
  0xa9   :  { %v270_v56 = vsel %vm63_vm4, %v266_v55, %v268_v54 }
  0xaa   :  { %335 = vmatprep.subr.mxu1 %v270_v56 }
  0xac   :  { %v264_v57 = vpop.permute.xlu1 %263  ;;  %v58_v58 = vpop.permute.xlu0 %57 }
  0xad   :  { %v64_v59 = vsel %vm63_vm4, %v58_v58, %v60_v52  ;;  %v269_v60 = vsel %vm63_vm4, %v264_v57, %v266_v55 }
  0xae   :  { %152 = vmatpush1.msra.mxu0 %v64_v59  ;;  %336 = vmatpush1.msra.mxu1 %v269_v60 }
  0xb0   :  { %v51_v61 = vpop.permute.xlu1 %50  ;;  %v49_v62 = vpop.permute.xlu0 %48 }
  0xb1   :  { %v54_v63 = vsel %vm52_vm5, %v49_v62, %v51_v61 }
  0xb2   :  { %153 = vmatprep.subr.mxu0 %v54_v63 }
  0xb4   :  { %v258_v2 = vpop.permute.xlu1 %257  ;;  %v256_v3 = vpop.permute.xlu0 %255 }
  0xb5   :  { %v260_v7 = vsel %vm52_vm5, %v256_v3, %v258_v2 }
  0xb6   :  { %337 = vmatprep.subr.mxu1 %v260_v7 }
  0xb8   :  { %v254_v8 = vpop.permute.xlu1 %253  ;;  %v47_v9 = vpop.permute.xlu0 %46 }
  0xb9   :  { %v53_v10 = vsel %vm52_vm5, %v47_v9, %v49_v62  ;;  %v259_v11 = vsel %vm52_vm5, %v254_v8, %v256_v3 }
  0xba   :  { %154 = vmatpush1.msra.mxu0 %v53_v10  ;;  %338 = vmatpush1.msra.mxu1 %v259_v11 }
  0xbc   :  { %v40_v12 = vpop.permute.xlu1 %39  ;;  %v38_v13 = vpop.permute.xlu0 %37 }
  0xbd   :  { %v43_v14 = vsel %vm41_vm6, %v38_v13, %v40_v12 }
  0xbe   :  { %155 = vmatprep.subr.mxu0 %v43_v14 }
  0xc0   :  { %v248_v15 = vpop.permute.xlu1 %247  ;;  %v246_v16 = vpop.permute.xlu0 %245 }
  0xc1   :  { %v250_v17 = vsel %vm41_vm6, %v246_v16, %v248_v15 }
  0xc2   :  { %339 = vmatprep.subr.mxu1 %v250_v17 }
  0xc4   :  { %v244_v18 = vpop.permute.xlu1 %243  ;;  %v36_v19 = vpop.permute.xlu0 %35 }
  0xc5   :  { %v42_v20 = vsel %vm41_vm6, %v36_v19, %v38_v13  ;;  %v249_v21 = vsel %vm41_vm6, %v244_v18, %v246_v16 }
  0xc6   :  { %156 = vmatpush1.msra.mxu0 %v42_v20  ;;  %340 = vmatpush1.msra.mxu1 %v249_v21 }
  0xc8   :  { %v29_v22 = vpop.permute.xlu1 %28  ;;  %v27_v23 = vpop.permute.xlu0 %26 }
  0xc9   :  { %v32_v24 = vsel %vm30_vm7, %v27_v23, %v29_v22 }
  0xca   :  { %157 = vmatprep.subr.mxu0 %v32_v24 }
  0xcc   :  { %v238_v25 = vpop.permute.xlu1 %237  ;;  %v236_v26 = vpop.permute.xlu0 %235 }
  0xcd   :  { %v240_v27 = vsel %vm30_vm7, %v236_v26, %v238_v25 }
  0xce   :  { %341 = vmatprep.subr.mxu1 %v240_v27 }
  0xd0   :  { %v234_v28 = vpop.permute.xlu1 %233  ;;  %v25_v29 = vpop.permute.xlu0 %24 }
  0xd1   :  { %v31_v30 = vsel %vm30_vm7, %v25_v29, %v27_v23  ;;  %v239_v31 = vsel %vm30_vm7, %v234_v28, %v236_v26 }
  0xd2   :  { %158 = vmatpush1.msra.mxu0 %v31_v30  ;;  %342 = vmatpush1.msra.mxu1 %v239_v31 }
  0xd3   :  { %159 = vmatprep.subr.mxu0 %v472_v1  ;;  %343 = vmatprep.subr.mxu1 %v467_v0 }
  0xd4   :  { %160 = vmatpush1.msra.mxu0 %v490_v5  ;;  %344 = vmatpush1.msra.mxu1 %v485_v4 }
  0xd5   :  { %407 = vmatmul.mubr.msk.f32.vlgmr.msra.gmra.mxu0 %vm122_vm8, %v14_v32  ;;  %412 = vmatmul.mubr.msk.f32.vlgmr.msra.gmra.mxu1 %vm122_vm8, %v14_v32 }
  0xd6   :  { %199 = vmatprep.mubr.f32.mxu0 %v440_v6  ;;  %383 = vmatprep.mubr.f32.mxu1 %v440_v6 }
  0xd9   :  { %408 = vmatmul.mubr.msk.f32.gmra.mxu0 %vm122_vm8, %v15_v33  ;;  %413 = vmatmul.mubr.msk.f32.gmra.mxu1 %vm122_vm8, %v15_v33 }
  0xdd   :  { %v120_v34 = vpop.permute.xlu1 %119  ;;  %v115_v1 = vpop.permute.xlu0 %114 }
  0xe2   :  { %v212_v37 = vpop.permute.xlu1 %211  ;;  %v216_v56 = vpop.permute.xlu0 %215 }
 0x195   :  { %v195_v35 = vpop.f32.mrf.mxu0  ;;  %v379_v0 = vpop.f32.mrf.mxu1 }
 0x196   :  { %v196_v36 = vadd.f32 %v195_v35, %v115_v1  ;;  %v380_v5 = vadd.f32 %v379_v0, %v115_v1 }
 0x197   :  { %v197_v4 = vpop.f32.mrf.mxu0  ;;  %v381_v38 = vpop.f32.mrf.mxu1 }
 0x198   :  { %v198_v39 = vadd.f32 %v197_v4, %v115_v1  ;;  %v382_v40 = vadd.f32 %v381_v38, %v115_v1  ;;  %v206_v41 = vmax.f32 %v196_v36, 0.0  ;;  %v390_v42 = vmax.f32 %v380_v5, 0.0 }
 0x199   :  { %v201_v6 = vpop.f32.mrf.mxu0  ;;  %v385_v43 = vpop.f32.mrf.mxu1 }
 0x19a   :  { %v207_v44 = vmax.f32 %v198_v39, 0.0  ;;  %v391_v45 = vmax.f32 %v382_v40, 0.0  ;;  %v218_v46 = vadd.f32 %v212_v37, %v206_v41  ;;  %v394_v47 = vadd.f32 %v390_v42, %v212_v37 }
 0x19b   :  { %v202_v48 = vadd.f32 %v201_v6, %v120_v34  ;;  %v386_v49 = vadd.f32 %v385_v43, %v120_v34  ;;  %v203_v50 = vpop.f32.mrf.mxu0  ;;  %v387_v51 = vpop.f32.mrf.mxu1 }
 0x19c   :  { %v219_v52 = vadd.f32 %v212_v37, %v207_v44  ;;  %222 = vst [vmem:[%s569_s3] sm:$0xff] %v218_v46  ;;  %v395_v53 = vadd.f32 %v391_v45, %v212_v37  ;;  %414 = vst [vmem:[%s569_s3 + $0x20] sm:$0xff] %v394_v47  ;;  %v204_v54 = vadd.f32 %v203_v50, %v120_v34 }
 0x19d   :  { %v388_v55 = vadd.f32 %v387_v51, %v120_v34  ;;  %v208_v57 = vmax.f32 %v202_v48, 0.0  ;;  %v392_v58 = vmax.f32 %v386_v49, 0.0 }
 0x19e   :  { %223 = vst [vmem:[%s569_s3 + $0x8] sm:$0xff] %v219_v52  ;;  %415 = vst [vmem:[%s569_s3 + $0x28] sm:$0xff] %v395_v53  ;;  %v209_v59 = vmax.f32 %v204_v54, 0.0 }
 0x19f   :  { %v393_v60 = vmax.f32 %v388_v55, 0.0  ;;  %v220_v61 = vadd.f32 %v216_v56, %v208_v57  ;;  %v396_v62 = vadd.f32 %v392_v58, %v216_v56 }
 0x1a0   :  { %v221_v63 = vadd.f32 %v216_v56, %v209_v59 }
 0x1a1   :  { %v397_v2 = vadd.f32 %v393_v60, %v216_v56  ;;  %224 = vst [vmem:[%s569_s3 + $0x10] sm:$0xff] %v220_v61  ;;  %416 = vst [vmem:[%s569_s3 + $0x30] sm:$0xff] %v396_v62 }
 0x1a2   :  { %225 = vst [vmem:[%s569_s3 + $0x18] sm:$0xff] %v221_v63 }
 0x1a3   :  { %417 = vst [vmem:[%s569_s3 + $0x38] sm:$0xff] %v397_v2 }

</bundles_post_ra>
